<compile_context>
chip_gen: v7x
topology: tpu7x:2x2x1
jax: 0.10.0
libtpu: 0.0.40
codegen_flags: <defaults>
</compile_context>

<pallas_src>
import jax
import jax.numpy as jnp
from jax.experimental import pallas as pl
from jax.experimental.pallas import tpu as pltpu

LANES = 128
MAX_ROW_TILE = 1024  # 1024 x 128 f32 = 512 KiB per block (x2 for double buffer)


def _round_up(x: int, m: int) -> int:
    return ((x + m - 1) // m) * m


def _make_mean_kernel(row_tile: int, total_rows: int, inv_n: float, need_mask: bool):
    """Build the reduction kernel with trace-time constants baked in."""

    def kernel(x_ref, o_ref, acc_ref):
        # x_ref:   (row_tile, LANES) VMEM tile of the flattened input (native dtype)
        # o_ref:   (1, 1) SMEM f32 output (the mean)
        # acc_ref: (8, LANES) f32 VMEM vector accumulator (partial sums)
        i = pl.program_id(0)

        @pl.when(i == 0)
        def _init():
            acc_ref[...] = jnp.zeros_like(acc_ref)

        x = x_ref[...].astype(jnp.float32)

        if need_mask:
            # Only the last block can be ragged; rows past `total_rows` are
            # out-of-bounds garbage in the boundary block -> zero them out.
            row_ids = i * row_tile + jax.lax.broadcasted_iota(
                jnp.int32, (row_tile, LANES), 0
            )
            x = jnp.where(row_ids < total_rows, x, jnp.float32(0.0))

        # (row_tile, 128) -> (row_tile//8, 8, 128): pure sublane regrouping,
        # then a VPU-only add-reduce over the leading axis into the (8,128)
        # accumulator. No per-step XLU / scalar work.
        acc_ref[...] += x.reshape(row_tile // 8, 8, LANES).sum(axis=0)

        @pl.when(i == pl.num_programs(0) - 1)
        def _finalize():
            # Single cross-lane/sublane reduce + multiply by constant 1/n.
            o_ref[0, 0] = jnp.sum(acc_ref[...]) * jnp.float32(inv_n)

    return kernel


def simple_loss(inputs: jax.Array) -> jax.Array:
    """Equivalent of torch.mean(inputs) over all elements."""
    n = int(inputs.size)
    inv_n = 1.0 / n  # compile-time constant; no scalar prefetch needed

    # Flatten in native dtype; the f32 cast happens per-tile inside the kernel.
    flat = inputs.reshape(-1)

    # Pad only a tiny ragged lane tail (< 128 elements). For n % 128 == 0
    # (e.g. 2*4*16*16 = 2048) this branch is skipped entirely.
    pad = (-n) % LANES
    if pad:
        flat = jnp.pad(flat, (0, pad))
    rows = (n + pad) // LANES
    x2d = flat.reshape(rows, LANES)

    # Minimal sublane tile for the input dtype: f32 -> 8, bf16 -> 16, int8 -> 32.
    itemsize = jnp.dtype(inputs.dtype).itemsize
    min_sub = max(8, 32 // max(itemsize, 1))

    row_tile = min(MAX_ROW_TILE, _round_up(rows, min_sub))
    num_blocks = pl.cdiv(rows, row_tile)
    need_mask = (rows % row_tile) != 0

    kernel = _make_mean_kernel(row_tile, rows, inv_n, need_mask)

    out = pl.pallas_call(
        kernel,
        out_shape=jax.ShapeDtypeStruct((1, 1), jnp.float32),
        grid=(num_blocks,),
        in_specs=[pl.BlockSpec((row_tile, LANES), lambda i: (i, 0))],
        out_specs=pl.BlockSpec((1, 1), lambda i: (0, 0), memory_space=pltpu.SMEM),
        scratch_shapes=[pltpu.VMEM((8, LANES), jnp.float32)],
        compiler_params=pltpu.CompilerParams(
            dimension_semantics=("arbitrary",)  # accumulator carried across steps
        ),
    )(x2d)

    return out[0, 0]


if __name__ == "__main__":
    key = jax.random.PRNGKey(0)
    x = jax.random.normal(key, (2, 4, 16, 16), dtype=jnp.float32)

    result = simple_loss(x)
    jax.block_until_ready(result)

    # sanity check against plain JAX mean
    ref = jnp.mean(x)
    assert jnp.allclose(result, ref, atol=1e-6, rtol=1e-5), (result, ref)

    print("KERNEL_OK")
</pallas_src>

<mosaic_0001>
module attributes {stable_mosaic.version = 11 : i64} {
  func.func @kernel(%arg0: i32, %arg1: memref<16x128xf32, #tpu.memory_space<vmem>>, %arg2: memref<1x1xf32, #tpu.memory_space<smem>>, %arg3: memref<8x128xf32, #tpu.memory_space<vmem>>) attributes {dimension_semantics = [#tpu.dimension_semantics<arbitrary>], iteration_bounds = array<i64: 1>, scalar_prefetch = 0 : i64, scratch_operands = 1 : i64, tpu.core_type = #tpu.core_type<tc>, window_params = [{transform_indices = @transform_0, window_bounds = array<i64: 16, 128>}, {transform_indices = @transform_1, window_bounds = array<i64: 1, 1>}]} {
    %c0_i32 = arith.constant 0 : i32
    %0 = arith.cmpi eq, %arg0, %c0_i32 : i32
    %1 = arith.extui %0 : i1 to i32
    %c0_i32_0 = arith.constant 0 : i32
    %2 = arith.cmpi ne, %1, %c0_i32_0 : i32
    scf.if %2 {
      %cst_8 = arith.constant 0.000000e+00 : f32
      %12 = vector.broadcast %cst_8 : f32 to vector<8x128xf32>
      %c0_9 = arith.constant 0 : index
      %c0_10 = arith.constant 0 : index
      %13 = vector.load %arg3[%c0_9, %c0_10] : memref<8x128xf32, #tpu.memory_space<vmem>>, vector<8x128xf32>
      tpu.vector_store %arg3[%c0_9, %c0_10], %12 {strides = array<i32>} : memref<8x128xf32, #tpu.memory_space<vmem>>, vector<8x128xf32>,
    } else {
    }
    %c0 = arith.constant 0 : index
    %c0_1 = arith.constant 0 : index
    %3 = vector.load %arg1[%c0, %c0_1] : memref<16x128xf32, #tpu.memory_space<vmem>>, vector<16x128xf32>
    %c0_2 = arith.constant 0 : index
    %c0_3 = arith.constant 0 : index
    %4 = vector.load %arg3[%c0_2, %c0_3] : memref<8x128xf32, #tpu.memory_space<vmem>>, vector<8x128xf32>
    %5 = vector.shape_cast %3 : vector<16x128xf32> to vector<2x8x128xf32>
    %cst = arith.constant dense<0.000000e+00> : vector<8x128xf32>
    %6 = vector.multi_reduction <add>, %5, %cst [0] : vector<2x8x128xf32> to vector<8x128xf32>
    %7 = arith.addf %4, %6 : vector<8x128xf32>
    %c0_4 = arith.constant 0 : index
    %c0_5 = arith.constant 0 : index
    %8 = vector.load %arg3[%c0_4, %c0_5] : memref<8x128xf32, #tpu.memory_space<vmem>>, vector<8x128xf32>
    tpu.vector_store %arg3[%c0_4, %c0_5], %7 {strides = array<i32>} : memref<8x128xf32, #tpu.memory_space<vmem>>, vector<8x128xf32>,
    %c0_i32_6 = arith.constant 0 : i32
    %9 = arith.cmpi eq, %arg0, %c0_i32_6 : i32
    %10 = arith.extui %9 : i1 to i32
    %c0_i32_7 = arith.constant 0 : i32
    %11 = arith.cmpi ne, %10, %c0_i32_7 : i32
    scf.if %11 {
      %c0_8 = arith.constant 0 : index
      %c0_9 = arith.constant 0 : index
      %12 = vector.load %arg3[%c0_8, %c0_9] : memref<8x128xf32, #tpu.memory_space<vmem>>, vector<8x128xf32>
      %13 = vector.shape_cast %12 : vector<8x128xf32> to vector<1x8x128xf32>
      %cst_10 = arith.constant dense<0.000000e+00> : vector<1xf32>
      %14 = vector.multi_reduction <add>, %13, %cst_10 [1, 2] : vector<1x8x128xf32> to vector<1xf32>
      %15 = vector.shape_cast %14 : vector<1xf32> to vector<1x1x1xf32>
      %16 = vector.extract %15[0, 0, 0] : f32 from vector<1x1x1xf32>
      %cst_11 = arith.constant 4.8828125E-4 : f32
      %17 = arith.mulf %16, %cst_11 : f32
      %c0_12 = arith.constant 0 : index
      %c0_13 = arith.constant 0 : index
      %18 = memref.load %arg2[%c0_12, %c0_13] : memref<1x1xf32, #tpu.memory_space<smem>>
      memref.store %17, %arg2[%c0_12, %c0_13] : memref<1x1xf32, #tpu.memory_space<smem>>
    } else {
    }
    return
  }
  func.func @transform_0(%arg0: i32) -> (i32, i32) {
    %c0_i32 = arith.constant 0 : i32
    %c0_i32_0 = arith.constant 0 : i32
    return %arg0, %c0_i32 : i32, i32
  }
  func.func @transform_1(%arg0: i32) -> (i32, i32) {
    %c0_i32 = arith.constant 0 : i32
    %c0_i32_0 = arith.constant 0 : i32
    %c0_i32_1 = arith.constant 0 : i32
    return %c0_i32, %c0_i32_0 : i32, i32
  }
}

</mosaic_0001>

<bundles_post_ra>
// kernel: tpu_custom_call.1
= control target key start
LH: loop header
LB: loop body
LE: loop exit
PB: predicated region body
PF: predicated region fallthrough
CT: control target
= control target key end

     0   :  { %6 = vsyncpa [#allocation4], 0  ;;  %s144_s0 = inlined_call_operand.hbm [shape: f32[16,128], index: 0, kind: input, shape index: {}]   ;;  %s145_s1 = inlined_call_operand.hbm [shape: f32[1,1], index: 1, kind: output, shape index: {}]  }
   0x1   :  { %7 = vsyncpa [#allocation5], 0  ;;  %s106_s6 = smov [#allocation3]   ;;  %s70_s10 = scalar_lea.hbm %s144_s0, 256 }
   0x2   :  { %s13_s7 = sshll.u32 %s106_s6, 4  ;;  %p71_p0 = scmp.ne.s32.totalorder %s144_s0, %s70_s10  ;;  %s14_s7 = int_to_ptr.vmem [resolvable:$true] %s13_s7 }
   0x3   :  { %p74_p1 = scmp.lt.u32.totalorder %s70_s10, %s144_s0 }
   0x5   :  { %p76_p2 = pnand %p74_p1, %p71_p0 }
   0x7   :  { %79 = shalt.err (!%p76_p2)
}
   0x8   :  { %s80_s15 = scalar_lea.vmem %s14_s7, 256  ;;  %p85_p4 = scmp.lt.s32.totalorder %s14_s7, %s14_s7 }
   0x9   :  { %p81_p3 = scmp.ne.s32.totalorder %s14_s7, %s80_s15  ;;  %p86_p5 = scmp.lt.s32.totalorder %s80_s15, %s80_s15 }
   0xb   :  { %p87_p6 = por %p86_p5, %p85_p4 }
   0xd   :  { %p88_p7 = pnand %p87_p6, %p81_p3 }
   0xf   :  { %91 = shalt.err (!%p88_p7)
}
  0x10   :  { %s107_s16 = smov 128   ;;  %s108_s17 = smov 8  }
  0x11   :  { %19 = dma.hbm_to_vmem [thread:$0]  %s144_s0, 256, %s14_s7, [#allocation4], %s107_s16, %s107_s16, %s108_s17  }
  0x12   :  { %102 = dma.done.wait [#allocation4], 256  }
  0x13   :  { %103 = vsyncadd [#allocation4], 4294967040  ;;  %v28_v0 = vld [vmem:[#allocation3] sm:$0xff]  ;;  %v29_v1 = vld [vmem:[#allocation3 + $0x8] sm:$0xff]  ;;  %s92_s0 = scalar_lea.hbm %s145_s1, 16 }
  0x14   :  { %v31_v2 = vadd.f32 %v29_v1, %v28_v0  ;;  %p93_p8 = scmp.ne.s32.totalorder %s145_s1, %s92_s0  ;;  %p96_p9 = scmp.lt.u32.totalorder %s92_s0, %s145_s1 }
  0x16   :  { %38 = vadd.xlane.f32.xlu0 %v31_v2  ;;  %p98_p10 = pnand %p96_p9, %p93_p8 }
  0xa3   :  { %v39_v3 = vpop.xlane.xlu0 %38 }
  0xa4   :  { %v40_v4 = vrot.slane %v39_v3, 4 }
  0xa6   :  { %v41_v5 = vadd.f32 %v40_v4, %v39_v3 }
  0xa8   :  { %v42_v6 = vrot.slane %v41_v5, 2 }
  0xaa   :  { %v43_v7 = vadd.f32 %v42_v6, %v41_v5 }
  0xac   :  { %v44_v8 = vrot.slane %v43_v7, 1 }
  0xae   :  { %v45_v9 = vadd.f32 %v44_v8, %v43_v7 }
  0xb0   :  { %64 = vpush %v45_v9 }
  0xe1   :  { %s65_s20 = spop %64 }
  0xe2   :  { %s47_s21 = smul.f32 0.00048828125, %s65_s20 }
  0xe4   :  { %49 = sst [smem:[#allocation6]] %s47_s21 }
  0xe5   :  { %101 = shalt.err (!%p98_p10)
}
  0xe6   :  { %s109_s28 = smov [#allocation6]  }
  0xe7   :  { %57 = dma.smem_to_hbm %s109_s28, 16, %s145_s1, [#allocation5]  }
  0xe8   :  { %104 = dma.done.wait [#allocation5], 16  }
  0xe9   :  { %105 = vsyncadd [#allocation5], 4294967280 }
  0xea   :  { %61 = sfence }
  0xeb   :  { %62 = vsyncpa [#allocation4], 1 }
  0xec   :  { %63 = vsyncpa [#allocation5], 1 }

</bundles_post_ra>
